<compile_context>
chip_gen: v7x
topology: tpu7x:2x2x1
jax: 0.10.0
libtpu: 0.0.40
codegen_flags: <defaults>
</compile_context>

<pallas_src>
import functools

import jax
import jax.numpy as jnp
import numpy as np
from jax.experimental import pallas as pl
from jax.experimental.pallas import tpu as pltpu


def _round_up(x, m):
    return ((x + m - 1) // m) * m


def _pick_tile(dim, candidates):
    for c in candidates:
        if dim % c == 0:
            return c
    return dim


def _time_block(T, cap=32):
    for tt in range(min(T, cap), 0, -1):
        if T % tt == 0:
            return tt
    return 1


# ---------------------------------------------------------------------------
# Parallel matmul + bias kernel (input projection and vocab projection).
# ---------------------------------------------------------------------------
def _matmul_bias_kernel(x_ref, w_ref, b_ref, o_ref):
    o_ref[...] = (jnp.dot(x_ref[...], w_ref[...],
                          preferred_element_type=jnp.float32)
                  + b_ref[...]).astype(o_ref.dtype)


def _matmul_bias(x, w, b, *, out_dtype=jnp.float32):
    M, K = x.shape
    _, N = w.shape
    tm = _pick_tile(M, (512, 256, 128, 64, 32, 16, 8))
    tn = _pick_tile(N, (512, 256, 128))
    bytes_acc = (M * K * x.dtype.itemsize + K * N * w.dtype.itemsize
                 + N * b.dtype.itemsize + M * N * np.dtype(out_dtype).itemsize)
    return pl.pallas_call(
        _matmul_bias_kernel,
        out_shape=jax.ShapeDtypeStruct((M, N), out_dtype),
        grid_spec=pltpu.PrefetchScalarGridSpec(
            num_scalar_prefetch=0,
            grid=(M // tm, N // tn),
            in_specs=[
                pl.BlockSpec((tm, K), lambda i, j: (i, 0)),
                pl.BlockSpec((K, tn), lambda i, j: (0, j)),
                pl.BlockSpec((1, tn), lambda i, j: (0, j)),
            ],
            out_specs=pl.BlockSpec((tm, tn), lambda i, j: (i, j)),
        ),
        compiler_params=pltpu.CompilerParams(
            dimension_semantics=("parallel", "parallel"),
            vmem_limit_bytes=32 * 1024 * 1024),
        cost_estimate=pl.CostEstimate(flops=2 * M * K * N, transcendentals=0,
                                      bytes_accessed=bytes_acc),
    )(x, w, b)


# ---------------------------------------------------------------------------
# Sequential LSTM recurrence kernel: gates_x is precomputed; per step only the
# small (B,H)x(H,4H) recurrent matmul + VPU/EUP gate math runs on the serial
# path. Tt timesteps per grid step, h/c state in VMEM scratch.
# ---------------------------------------------------------------------------
def _lstm_recurrence_kernel(gx_ref, whh_ref, h0_ref, c0_ref,
                            hseq_ref, hn_ref, cn_ref,
                            h_sc, c_sc, *, hidden, t_block):
    t = pl.program_id(1)

    @pl.when(t == 0)
    def _():
        h_sc[...] = h0_ref[...]
        c_sc[...] = c0_ref[...]

    whh = whh_ref[...]            # (H_pad, 4*H_pad) bf16, resident
    H = hidden                    # padded hidden -> lane-aligned gate slices

    def step(i, carry):
        h_prev, c_prev = carry
        # f32 gate pre-activations: precomputed input part + recurrent matmul.
        g = gx_ref[i] + jnp.dot(h_prev.astype(whh.dtype), whh,
                                preferred_element_type=jnp.float32)
        i_g = jax.nn.sigmoid(g[:, 0 * H:1 * H])
        f_g = jax.nn.sigmoid(g[:, 1 * H:2 * H])
        g_g = jnp.tanh(g[:, 2 * H:3 * H])
        o_g = jax.nn.sigmoid(g[:, 3 * H:4 * H])
        c_new = f_g * c_prev + i_g * g_g
        h_new = o_g * jnp.tanh(c_new)
        hseq_ref[i] = h_new.astype(hseq_ref.dtype)   # dense (B_blk, H_pad) store
        return h_new, c_new

    h_last, c_last = jax.lax.fori_loop(0, t_block, step,
                                       (h_sc[...], c_sc[...]), unroll=True)
    h_sc[...] = h_last
    c_sc[...] = c_last

    @pl.when(t == pl.num_programs(1) - 1)
    def _():
        hn_ref[...] = h_last
        cn_ref[...] = c_last


def _lstm_recurrence(gates_x, whh_t, h0, c0, *, T, Tt, B_pad, B_blk, H_pad,
                     h_dtype):
    nb = B_pad // B_blk
    nt = T // Tt
    G = 4 * H_pad
    kernel = functools.partial(_lstm_recurrence_kernel, hidden=H_pad, t_block=Tt)
    flops = 2 * T * B_pad * H_pad * G + 10 * T * B_pad * H_pad
    transc = 5 * T * B_pad * H_pad
    bytes_acc = (gates_x.size * 4 + whh_t.size * whh_t.dtype.itemsize
                 + T * B_pad * H_pad * np.dtype(h_dtype).itemsize
                 + 6 * B_pad * H_pad * 4)
    return pl.pallas_call(
        kernel,
        out_shape=(
            jax.ShapeDtypeStruct((T, B_pad, H_pad), h_dtype),    # h_seq
            jax.ShapeDtypeStruct((B_pad, H_pad), jnp.float32),   # h_n
            jax.ShapeDtypeStruct((B_pad, H_pad), jnp.float32),   # c_n
        ),
        grid_spec=pltpu.PrefetchScalarGridSpec(
            num_scalar_prefetch=0,
            grid=(nb, nt),
            in_specs=[
                pl.BlockSpec((Tt, B_blk, G), lambda b, t: (t, b, 0)),   # gates_x
                pl.BlockSpec((H_pad, G), lambda b, t: (0, 0)),          # W_hh^T
                pl.BlockSpec((B_blk, H_pad), lambda b, t: (b, 0)),      # h0
                pl.BlockSpec((B_blk, H_pad), lambda b, t: (b, 0)),      # c0
            ],
            out_specs=[
                pl.BlockSpec((Tt, B_blk, H_pad), lambda b, t: (t, b, 0)),  # h_seq
                pl.BlockSpec((B_blk, H_pad), lambda b, t: (b, 0)),         # h_n
                pl.BlockSpec((B_blk, H_pad), lambda b, t: (b, 0)),         # c_n
            ],
            scratch_shapes=[
                pltpu.VMEM((B_blk, H_pad), jnp.float32),   # h state
                pltpu.VMEM((B_blk, H_pad), jnp.float32),   # c state
            ],
        ),
        compiler_params=pltpu.CompilerParams(
            dimension_semantics=("parallel", "arbitrary"),
            vmem_limit_bytes=32 * 1024 * 1024),
        cost_estimate=pl.CostEstimate(flops=flops, transcendentals=transc,
                                      bytes_accessed=bytes_acc),
    )(gates_x, whh_t, h0, c0)


# ---------------------------------------------------------------------------
# Full forward: embedding gather (glue) -> input projection -> recurrence -> FC.
# ---------------------------------------------------------------------------
def agent_model_forward(x_tokens, params, hidden=None):
    """x_tokens: int32 (B, T). Returns (logits (B,T,V), (h_n (1,B,H), c_n (1,B,H)))."""
    emb = params["embedding"]            # (V, E)
    V, E = emb.shape
    H = params["w_hh"].shape[1]
    B, T = x_tokens.shape

    E_pad = _round_up(E, 128)
    H_pad = _round_up(H, 128)
    V_pad = _round_up(V, 128)
    B_pad = _round_up(B, 8)
    B_blk = B_pad if B_pad <= 128 else 128
    B_pad = _round_up(B_pad, B_blk)
    Tt = _time_block(T, cap=32)
    cdt = jnp.bfloat16               # MXU input dtype (f32 accumulation)

    # ---- parameter prep: transpose + per-gate pad to lane-aligned layout ----
    wih_t = jnp.transpose(params["w_ih"]).reshape(E, 4, H)
    wih_t = jnp.pad(wih_t, ((0, E_pad - E), (0, 0), (0, H_pad - H)))
    wih_t = wih_t.reshape(E_pad, 4 * H_pad).astype(cdt)

    whh_t = jnp.transpose(params["w_hh"]).reshape(H, 4, H)
    whh_t = jnp.pad(whh_t, ((0, H_pad - H), (0, 0), (0, H_pad - H)))
    whh_t = whh_t.reshape(H_pad, 4 * H_pad).astype(cdt)

    bias = (params["b_ih"] + params["b_hh"]).reshape(4, H)
    bias = jnp.pad(bias, ((0, 0), (0, H_pad - H)))
    bias = bias.reshape(1, 4 * H_pad).astype(jnp.float32)

    wfc_t = jnp.pad(jnp.transpose(params["w_fc"]),
                    ((0, H_pad - H), (0, V_pad - V))).astype(cdt)
    bfc = jnp.pad(params["b_fc"], (0, V_pad - V)).reshape(1, V_pad).astype(jnp.float32)

    # ---- embedding gather + time-major, padded layout (glue) ----
    emb_pad = jnp.pad(emb, ((0, 0), (0, E_pad - E)))
    x_bte = jnp.take(emb_pad, x_tokens, axis=0)                  # (B, T, E_pad)
    x_tbe = jnp.transpose(x_bte, (1, 0, 2))                      # (T, B, E_pad)
    x_tbe = jnp.pad(x_tbe, ((0, 0), (0, B_pad - B), (0, 0))).astype(cdt)

    # ---- 1) parallel input projection: (T*B, E) @ (E, 4H) + bias ----
    gates_x = _matmul_bias(x_tbe.reshape(T * B_pad, E_pad), wih_t, bias)
    gates_x = gates_x.reshape(T, B_pad, 4 * H_pad)               # f32

    # ---- initial hidden state ----
    if hidden is None:
        h0 = jnp.zeros((B_pad, H_pad), jnp.float32)
        c0 = jnp.zeros((B_pad, H_pad), jnp.float32)
    else:
        h0 = jnp.pad(hidden[0][0].astype(jnp.float32),
                     ((0, B_pad - B), (0, H_pad - H)))
        c0 = jnp.pad(hidden[1][0].astype(jnp.float32),
                     ((0, B_pad - B), (0, H_pad - H)))

    # ---- 2) sequential recurrence ----
    h_seq, h_n, c_n = _lstm_recurrence(gates_x, whh_t, h0, c0, T=T, Tt=Tt,
                                       B_pad=B_pad, B_blk=B_blk, H_pad=H_pad,
                                       h_dtype=cdt)

    # ---- 3) parallel vocab projection: (T*B, H) @ (H, V) + b_fc ----
    logits2 = _matmul_bias(h_seq.reshape(T * B_pad, H_pad), wfc_t, bfc)
    logits = jnp.transpose(logits2.reshape(T, B_pad, V_pad)[:, :B, :V], (1, 0, 2))

    hidden_out = (h_n[None, :B, :H], c_n[None, :B, :H])
    return logits, hidden_out


def _reference_forward(x_tokens, params):
    """Pure-JAX f32 reference matching torch.nn.LSTM semantics."""
    emb = params["embedding"]
    w_ih, w_hh = params["w_ih"], params["w_hh"]
    b = params["b_ih"] + params["b_hh"]
    w_fc, b_fc = params["w_fc"], params["b_fc"]
    H = w_hh.shape[1]

    x = jnp.take(emb, x_tokens, axis=0)  # (B, T, E)
    B = x.shape[0]

    def step(carry, xt):
        h, c = carry
        g = xt @ w_ih.T + h @ w_hh.T + b
        i = jax.nn.sigmoid(g[:, 0 * H:1 * H])
        f = jax.nn.sigmoid(g[:, 1 * H:2 * H])
        gg = jnp.tanh(g[:, 2 * H:3 * H])
        o = jax.nn.sigmoid(g[:, 3 * H:4 * H])
        c_new = f * c + i * gg
        h_new = o * jnp.tanh(c_new)
        return (h_new, c_new), h_new

    init = (jnp.zeros((B, H), jnp.float32), jnp.zeros((B, H), jnp.float32))
    (h_n, c_n), hs = jax.lax.scan(step, init, jnp.transpose(x, (1, 0, 2)))
    outs = jnp.transpose(hs, (1, 0, 2)) @ w_fc.T + b_fc
    return outs, (h_n[None], c_n[None])


def init_params(key, vocab_size, embedding_dim, hidden_dim):
    ks = jax.random.split(key, 7)
    s = 0.1
    return {
        "embedding": s * jax.random.normal(ks[0], (vocab_size, embedding_dim), jnp.float32),
        "w_ih": s * jax.random.normal(ks[1], (4 * hidden_dim, embedding_dim), jnp.float32),
        "w_hh": s * jax.random.normal(ks[2], (4 * hidden_dim, hidden_dim), jnp.float32),
        "b_ih": s * jax.random.normal(ks[3], (4 * hidden_dim,), jnp.float32),
        "b_hh": s * jax.random.normal(ks[4], (4 * hidden_dim,), jnp.float32),
        "w_fc": s * jax.random.normal(ks[5], (vocab_size, hidden_dim), jnp.float32),
        "b_fc": s * jax.random.normal(ks[6], (vocab_size,), jnp.float32),
    }


if __name__ == "__main__":
    vocab_size, embedding_dim, hidden_dim = 32, 16, 32
    batch, seq = 2, 8

    key = jax.random.PRNGKey(0)
    k_par, k_tok = jax.random.split(key)
    params = init_params(k_par, vocab_size, embedding_dim, hidden_dim)
    x_tokens = jax.random.randint(k_tok, (batch, seq), 0, vocab_size, dtype=jnp.int32)

    logits, (h_n, c_n) = agent_model_forward(x_tokens, params)
    jax.block_until_ready((logits, h_n, c_n))

    ref_logits, (ref_h, ref_c) = _reference_forward(x_tokens, params)
    assert logits.shape == (batch, seq, vocab_size)
    assert h_n.shape == (1, batch, hidden_dim) and c_n.shape == (1, batch, hidden_dim)
    # bf16 MXU inputs (f32 accumulation) -> loosened tolerances vs f32 reference.
    assert jnp.allclose(logits, ref_logits, atol=3e-2, rtol=3e-2)
    assert jnp.allclose(h_n, ref_h, atol=3e-2, rtol=3e-2)
    assert jnp.allclose(c_n, ref_c, atol=3e-2, rtol=3e-2)

    print("KERNEL_OK")
</pallas_src>

<mosaic_0001>
module attributes {stable_mosaic.version = 11 : i64} {
  func.func @_matmul_bias_kernel(%arg0: i32, %arg1: i32, %arg2: memref<64x128xbf16, #tpu.memory_space<vmem>>, %arg3: memref<128x512xbf16, #tpu.memory_space<vmem>>, %arg4: memref<1x512xf32, #tpu.memory_space<vmem>>, %arg5: memref<64x512xf32, #tpu.memory_space<vmem>>) attributes {dimension_semantics = [#tpu.dimension_semantics<parallel>, #tpu.dimension_semantics<parallel>], iteration_bounds = array<i64: 1, 1>, scalar_prefetch = 0 : i64, scratch_operands = 0 : i64, tpu.core_type = #tpu.core_type<tc>, window_params = [{transform_indices = @transform_0, window_bounds = array<i64: 64, 128>}, {transform_indices = @transform_1, window_bounds = array<i64: 128, 512>}, {transform_indices = @transform_2, window_bounds = array<i64: 1, 512>}, {transform_indices = @transform_3, window_bounds = array<i64: 64, 512>}]} {
    %c0 = arith.constant 0 : index
    %c0_0 = arith.constant 0 : index
    %0 = vector.load %arg2[%c0, %c0_0] : memref<64x128xbf16, #tpu.memory_space<vmem>>, vector<64x128xbf16>
    %c0_1 = arith.constant 0 : index
    %c0_2 = arith.constant 0 : index
    %1 = vector.load %arg3[%c0_1, %c0_2] : memref<128x512xbf16, #tpu.memory_space<vmem>>, vector<128x512xbf16>
    %cst = arith.constant dense<0.000000e+00> : vector<64x512xf32>
    %2 = tpu.matmul %0, %1, %cst {dimension_numbers = #tpu.dot_dimension_numbers<[1], [0], [0], [1], [0, 0, 1, 1], [], []>} : vector<64x128xbf16>, vector<128x512xbf16>, vector<64x512xf32> -> vector<64x512xf32>
    %c0_3 = arith.constant 0 : index
    %c0_4 = arith.constant 0 : index
    %3 = vector.load %arg4[%c0_3, %c0_4] : memref<1x512xf32, #tpu.memory_space<vmem>>, vector<1x512xf32>
    %4 = vector.broadcast %3 : vector<1x512xf32> to vector<64x512xf32>
    %5 = arith.addf %2, %4 : vector<64x512xf32>
    %c0_5 = arith.constant 0 : index
    %c0_6 = arith.constant 0 : index
    %6 = vector.load %arg5[%c0_5, %c0_6] : memref<64x512xf32, #tpu.memory_space<vmem>>, vector<64x512xf32>
    tpu.vector_store %arg5[%c0_5, %c0_6], %5 {strides = array<i32>} : memref<64x512xf32, #tpu.memory_space<vmem>>, vector<64x512xf32>,
    return
  }
  func.func @transform_0(%arg0: i32, %arg1: i32) -> (i32, i32) {
    %c0_i32 = arith.constant 0 : i32
    %c0_i32_0 = arith.constant 0 : i32
    return %arg0, %c0_i32 : i32, i32
  }
  func.func @transform_1(%arg0: i32, %arg1: i32) -> (i32, i32) {
    %c0_i32 = arith.constant 0 : i32
    %c0_i32_0 = arith.constant 0 : i32
    return %c0_i32, %arg1 : i32, i32
  }
  func.func @transform_2(%arg0: i32, %arg1: i32) -> (i32, i32) {
    %c0_i32 = arith.constant 0 : i32
    %c0_i32_0 = arith.constant 0 : i32
    return %c0_i32, %arg1 : i32, i32
  }
  func.func @transform_3(%arg0: i32, %arg1: i32) -> (i32, i32) {
    %c0_i32 = arith.constant 0 : i32
    return %arg0, %arg1 : i32, i32
  }
}

</mosaic_0001>

<bundles_post_ra>
// kernel: tpu_custom_call.1
= control target key start
LH: loop header
LB: loop body
LE: loop exit
PB: predicated region body
PF: predicated region fallthrough
CT: control target
= control target key end

     0   :  { %8 = vsyncpa [#allocation3], 0  ;;  %s773_s0 = inlined_call_operand.hbm [shape: bf16[64,128], index: 0, kind: input, shape index: {}]   ;;  %s774_s1 = inlined_call_operand.hbm [shape: bf16[128,512], index: 1, kind: input, shape index: {}]   ;;  %s775_s2 = inlined_call_operand.vmem [shape: f32[1,512], index: 2, kind: input, shape index: {}]   ;;  %s776_s3 = inlined_call_operand.hbm [shape: f32[64,512], index: 3, kind: output, shape index: {}]  }
   0x1   :  { %9 = vsyncpa [#allocation6], 0 }
   0x2   :  { %10 = vsyncpa [#allocation4], 0  ;;  %s656_s12 = smov [#allocation2]   ;;  %s584_s16 = scalar_lea.hbm %s773_s0, 512 }
   0x3   :  { %s16_s13 = sshll.u32 %s656_s12, 4  ;;  %p585_p0 = scmp.ne.s32.totalorder %s773_s0, %s584_s16  ;;  %s17_s13 = int_to_ptr.vmem [resolvable:$true] %s16_s13 }
   0x4   :  { %p588_p1 = scmp.lt.u32.totalorder %s584_s16, %s773_s0 }
   0x6   :  { %p590_p2 = pnand %p588_p1, %p585_p0 }
   0x8   :  { %593 = shalt.err (!%p590_p2)
}
   0x9   :  { %s594_s21 = scalar_lea.vmem %s17_s13, 512  ;;  %p599_p4 = scmp.lt.s32.totalorder %s17_s13, %s17_s13 }
   0xa   :  { %p595_p3 = scmp.ne.s32.totalorder %s17_s13, %s594_s21  ;;  %p600_p5 = scmp.lt.s32.totalorder %s594_s21, %s594_s21 }
   0xc   :  { %p601_p6 = por %p600_p5, %p599_p4 }
   0xe   :  { %p602_p7 = pnand %p601_p6, %p595_p3 }
  0x10   :  { %605 = shalt.err (!%p602_p7)
}
  0x11   :  { %s657_s22 = smov 64   ;;  %s658_s23 = smov 4  }
  0x12   :  { %22 = dma.hbm_to_vmem [thread:$0]  %s773_s0, 512, %s17_s13, [#allocation3], %s657_s22, %s657_s22, %s658_s23  }
  0x13   :  { %s659_s26 = smov [#allocation5]   ;;  %s606_s30 = scalar_lea.hbm %s774_s1, 4096 }
  0x14   :  { %s28_s27 = sshll.u32 %s659_s26, 4  ;;  %p607_p8 = scmp.ne.s32.totalorder %s774_s1, %s606_s30  ;;  %s29_s27 = int_to_ptr.vmem [resolvable:$true] %s28_s27 }
  0x15   :  { %p610_p9 = scmp.lt.u32.totalorder %s606_s30, %s774_s1 }
  0x17   :  { %p612_p10 = pnand %p610_p9, %p607_p8 }
  0x19   :  { %615 = shalt.err (!%p612_p10)
}
  0x1a   :  { %s616_s8 = scalar_lea.vmem %s29_s27, 4096  ;;  %p621_p12 = scmp.lt.s32.totalorder %s29_s27, %s29_s27 }
  0x1b   :  { %p617_p11 = scmp.ne.s32.totalorder %s29_s27, %s616_s8  ;;  %p622_p13 = scmp.lt.s32.totalorder %s616_s8, %s616_s8 }
  0x1d   :  { %p623_p0 = por %p622_p13, %p621_p12 }
  0x1f   :  { %p624_p1 = pnand %p623_p0, %p617_p11 }
  0x21   :  { %627 = shalt.err (!%p624_p1)
}
  0x22   :  { %s660_s0 = smov 256   ;;  %s661_s9 = smov 16  }
  0x23   :  { %34 = dma.hbm_to_vmem [thread:$0]  %s774_s1, 4096, %s29_s27, [#allocation6], %s660_s0, %s660_s0, %s661_s9  }
  0x24   :  { %650 = dma.done.wait [#allocation3], 512  }
  0x25   :  { %651 = vsyncadd [#allocation3], 4294966784 }
  0x26   :  { %652 = dma.done.wait [#allocation6], 4096  }
  0x27   :  { %653 = vsyncadd [#allocation6], 4294963200  ;;  %v662_v0 = vmov 0   ;;  %v532_v1 = vld [vmem:[#allocation5 + $0x4] ss:$16 sps:$4 sm:$0xff]   ;;  %v581_v34 = vld [vmem:[#allocation2 + $0x8] sm:$0xff]   ;;  %v86_v37 = vlaneseq }
  0x28   :  { %322 = vmatprep.mubr.bf16.mxu0 %v662_v0  ;;  %395 = vmatprep.mubr.bf16.mxu1 %v662_v0  ;;  %v534_v2 = vld [vmem:[#allocation5 + $0xc] ss:$16 sps:$4 sm:$0xff]   ;;  %v536_v3 = vld [vmem:[#allocation5] ss:$16 sps:$4 sm:$0xff]   ;;  %v537_v4 = vld [vmem:[#allocation5 + $0x8] ss:$16 sps:$4 sm:$0xff]  }
  0x29   :  { %290 = vmatprep.subr.bf16.mxu0 %v532_v1  ;;  %363 = vmatprep.subr.bf16.mxu1 %v534_v2  ;;  %v538_v5 = vld [vmem:[#allocation5 + $0x24] ss:$16 sps:$4 sm:$0xff]   ;;  %v540_v6 = vld [vmem:[#allocation5 + $0x2c] ss:$16 sps:$4 sm:$0xff]   ;;  %v542_v7 = vld [vmem:[#allocation5 + $0x20] ss:$16 sps:$4 sm:$0xff]  }
  0x2a   :  { %291 = vmatpush1.bf16.msra.mxu0 %v536_v3  ;;  %364 = vmatpush1.bf16.msra.mxu1 %v537_v4  ;;  %v543_v8 = vld [vmem:[#allocation5 + $0x28] ss:$16 sps:$4 sm:$0xff]   ;;  %v544_v9 = vld [vmem:[#allocation5 + $0x44] ss:$16 sps:$4 sm:$0xff]   ;;  %v546_v10 = vld [vmem:[#allocation5 + $0x4c] ss:$16 sps:$4 sm:$0xff]  }
  0x2b   :  { %292 = vmatprep.subr.bf16.mxu0 %v538_v5  ;;  %365 = vmatprep.subr.bf16.mxu1 %v540_v6  ;;  %v548_v11 = vld [vmem:[#allocation5 + $0x40] ss:$16 sps:$4 sm:$0xff]   ;;  %v549_v12 = vld [vmem:[#allocation5 + $0x48] ss:$16 sps:$4 sm:$0xff]   ;;  %v550_v13 = vld [vmem:[#allocation5 + $0x64] ss:$16 sps:$4 sm:$0xff]  }
  0x2c   :  { %v552_v14 = vld [vmem:[#allocation5 + $0x6c] ss:$16 sps:$4 sm:$0xff]   ;;  %v554_v15 = vld [vmem:[#allocation5 + $0x60] ss:$16 sps:$4 sm:$0xff]   ;;  %v555_v16 = vld [vmem:[#allocation5 + $0x68] ss:$16 sps:$4 sm:$0xff]  }
  0x2d   :  { %v556_v17 = vld [vmem:[#allocation5 + $0x84] ss:$16 sps:$4 sm:$0xff]   ;;  %v558_v18 = vld [vmem:[#allocation5 + $0x8c] ss:$16 sps:$4 sm:$0xff]   ;;  %v560_v19 = vld [vmem:[#allocation5 + $0x80] ss:$16 sps:$4 sm:$0xff]  }
  0x2e   :  { %293 = vmatpush1.bf16.msra.mxu0 %v542_v7  ;;  %366 = vmatpush1.bf16.msra.mxu1 %v543_v8  ;;  %v561_v20 = vld [vmem:[#allocation5 + $0x88] ss:$16 sps:$4 sm:$0xff]   ;;  %v562_v21 = vld [vmem:[#allocation5 + $0xa4] ss:$16 sps:$4 sm:$0xff]   ;;  %v564_v22 = vld [vmem:[#allocation5 + $0xac] ss:$16 sps:$4 sm:$0xff]  }
  0x2f   :  { %294 = vmatprep.subr.bf16.mxu0 %v544_v9  ;;  %367 = vmatprep.subr.bf16.mxu1 %v546_v10  ;;  %v566_v23 = vld [vmem:[#allocation5 + $0xa0] ss:$16 sps:$4 sm:$0xff]   ;;  %v567_v24 = vld [vmem:[#allocation5 + $0xa8] ss:$16 sps:$4 sm:$0xff]   ;;  %v568_v25 = vld [vmem:[#allocation5 + $0xc4] ss:$16 sps:$4 sm:$0xff]  }
  0x30   :  { %v570_v26 = vld [vmem:[#allocation5 + $0xcc] ss:$16 sps:$4 sm:$0xff]   ;;  %v572_v27 = vld [vmem:[#allocation5 + $0xc0] ss:$16 sps:$4 sm:$0xff]   ;;  %v573_v28 = vld [vmem:[#allocation5 + $0xc8] ss:$16 sps:$4 sm:$0xff]  }
  0x31   :  { %v574_v29 = vld [vmem:[#allocation5 + $0xe4] ss:$16 sps:$4 sm:$0xff]   ;;  %v576_v30 = vld [vmem:[#allocation5 + $0xec] ss:$16 sps:$4 sm:$0xff]   ;;  %v578_v31 = vld [vmem:[#allocation5 + $0xe0] ss:$16 sps:$4 sm:$0xff]  }
  0x32   :  { %295 = vmatpush1.bf16.msra.mxu0 %v548_v11  ;;  %368 = vmatpush1.bf16.msra.mxu1 %v549_v12  ;;  %v579_v32 = vld [vmem:[#allocation5 + $0xe8] ss:$16 sps:$4 sm:$0xff]   ;;  %v580_v33 = vld [vmem:[#allocation2] sm:$0xff]   ;;  %v582_v35 = vld [vmem:[#allocation2 + $0x10] sm:$0xff]   ;;  %v87_v38 = vshrl.u32 %v86_v37, 7 }
  0x33   :  { %296 = vmatprep.subr.bf16.mxu0 %v550_v13  ;;  %369 = vmatprep.subr.bf16.mxu1 %v552_v14  ;;  %v583_v36 = vld [vmem:[#allocation2 + $0x18] sm:$0xff]   ;;  %v84_v41 = vld [vmem:[%s775_s2] sm:$0xf]  ;;  %s663_s2 = smov [#allocation7]  }
  0x34   :  { %v88_v39 = vsub.s32 0, %v87_v38  ;;  %v96_v40 = vsub.s32 2, %v87_v38  ;;  %v92_v42 = vsub.s32 1, %v87_v38  ;;  %v100_v43 = vsub.s32 3, %v87_v38  ;;  %s473_s13 = sshll.u32 %s663_s2, 4  ;;  %s474_s13 = int_to_ptr.vmem [resolvable:$true] %s473_s13 }
  0x35   :  { %s628_s14 = scalar_lea.vmem %s474_s13, 4096  ;;  %p633_p3 = scmp.lt.s32.totalorder %s474_s13, %s474_s13 }
  0x36   :  { %297 = vmatpush1.bf16.msra.mxu0 %v554_v15  ;;  %370 = vmatpush1.bf16.msra.mxu1 %v555_v16  ;;  %v721_v44 = vrot.slane %v84_v41, %v88_v39  ;;  %v723_v45 = vrot.slane %v84_v41, %v96_v40  ;;  %v725_v46 = vrot.slane %v84_v41, %v92_v42  ;;  %p629_p2 = scmp.ne.s32.totalorder %s474_s13, %s628_s14  ;;  %p634_p4 = scmp.lt.s32.totalorder %s628_s14, %s628_s14 }
  0x37   :  { %298 = vmatprep.subr.bf16.mxu0 %v556_v17  ;;  %371 = vmatprep.subr.bf16.mxu1 %v558_v18  ;;  %v727_v47 = vrot.slane %v84_v41, %v100_v43 }
  0x38   :  { %p635_p5 = por %p634_p4, %p633_p3 }
  0x3a   :  { %299 = vmatpush1.bf16.msra.mxu0 %v560_v19  ;;  %372 = vmatpush1.bf16.msra.mxu1 %v561_v20  ;;  %p636_p6 = pnand %p635_p5, %p629_p2 }
  0x3b   :  { %300 = vmatprep.subr.bf16.mxu0 %v562_v21  ;;  %373 = vmatprep.subr.bf16.mxu1 %v564_v22 }
  0x3e   :  { %301 = vmatpush1.bf16.msra.mxu0 %v566_v23  ;;  %374 = vmatpush1.bf16.msra.mxu1 %v567_v24 }
  0x3f   :  { %302 = vmatprep.subr.bf16.mxu0 %v568_v25  ;;  %375 = vmatprep.subr.bf16.mxu1 %v570_v26 }
  0x42   :  { %303 = vmatpush1.bf16.msra.mxu0 %v572_v27  ;;  %376 = vmatpush1.bf16.msra.mxu1 %v573_v28 }
  0x43   :  { %304 = vmatprep.subr.bf16.mxu0 %v574_v29  ;;  %377 = vmatprep.subr.bf16.mxu1 %v576_v30 }
  0x46   :  { %305 = vmatpush1.bf16.msra.mxu0 %v578_v31  ;;  %378 = vmatpush1.bf16.msra.mxu1 %v579_v32 }
  0x49   :  { %323 = vmatmul.mubr.bf16.vlgmr.msra.gmra.mrb[0].mxu0 %v580_v33  ;;  %396 = vmatmul.mubr.bf16.vlgmr.msra.gmra.mrb[0].mxu1 %v580_v33 }
  0x4a   :  { %332 = vmatprep.mubr.bf16.mxu0 %v662_v0  ;;  %405 = vmatprep.mubr.bf16.mxu1 %v662_v0 }
  0x51   :  { %333 = vmatmul.mubr.bf16.gmra.mrb[4].mxu0 %v581_v34  ;;  %406 = vmatmul.mubr.bf16.gmra.mrb[4].mxu1 %v581_v34 }
  0x52   :  { %342 = vmatprep.mubr.bf16.mxu0 %v662_v0  ;;  %415 = vmatprep.mubr.bf16.mxu1 %v662_v0 }
  0x59   :  { %343 = vmatmul.mubr.bf16.gmra.mrb[8].mxu0 %v582_v35  ;;  %416 = vmatmul.mubr.bf16.gmra.mrb[8].mxu1 %v582_v35 }
  0x5a   :  { %352 = vmatprep.mubr.bf16.mxu0 %v662_v0  ;;  %425 = vmatprep.mubr.bf16.mxu1 %v662_v0 }
  0x61   :  { %353 = vmatmul.mubr.bf16.gmra.mrb[12].mxu0 %v583_v36  ;;  %426 = vmatmul.mubr.bf16.gmra.mrb[12].mxu1 %v583_v36 }
 0x11c   :  { %v324_v48 = vpop.f32.mrb[0].mxu0  ;;  %v397_v49 = vpop.f32.mrb[0].mxu1 }
 0x11d   :  { %v325_v50 = vadd.f32 %v324_v48, %v721_v44  ;;  %v398_v51 = vadd.f32 %v397_v49, %v723_v45  ;;  %v326_v52 = vpop.f32.mrb[1].mxu0  ;;  %v399_v53 = vpop.f32.mrb[1].mxu1 }
 0x11e   :  { %v327_v54 = vadd.f32 %v326_v52, %v725_v46  ;;  %v400_v55 = vadd.f32 %v399_v53, %v727_v47  ;;  %v328_v56 = vpop.f32.mrb[2].mxu0  ;;  %v401_v57 = vpop.f32.mrb[2].mxu1 }
 0x11f   :  { %436 = vst [vmem:[#allocation7] sm:$0xff] %v325_v50  ;;  %438 = vst [vmem:[#allocation7 + $0x10] sm:$0xff] %v398_v51  ;;  %v329_v58 = vadd.f32 %v328_v56, %v721_v44  ;;  %v402_v59 = vadd.f32 %v401_v57, %v723_v45  ;;  %v330_v60 = vpop.f32.mrb[3].mxu0  ;;  %v403_v61 = vpop.f32.mrb[3].mxu1 }
 0x120   :  { %437 = vst [vmem:[#allocation7 + $0x8] sm:$0xff] %v327_v54  ;;  %439 = vst [vmem:[#allocation7 + $0x18] sm:$0xff] %v400_v55  ;;  %v331_v62 = vadd.f32 %v330_v60, %v725_v46  ;;  %v404_v63 = vadd.f32 %v403_v61, %v727_v47 }
 0x121   :  { %440 = vst [vmem:[#allocation7 + $0x20] sm:$0xff] %v329_v58  ;;  %442 = vst [vmem:[#allocation7 + $0x30] sm:$0xff] %v402_v59 }
 0x122   :  { %441 = vst [vmem:[#allocation7 + $0x28] sm:$0xff] %v331_v62  ;;  %443 = vst [vmem:[#allocation7 + $0x38] sm:$0xff] %v404_v63 }
 0x124   :  { %v334_v0 = vpop.f32.mrb[4].mxu0  ;;  %v407_v1 = vpop.f32.mrb[4].mxu1 }
 0x125   :  { %v335_v2 = vadd.f32 %v334_v0, %v721_v44  ;;  %v408_v3 = vadd.f32 %v407_v1, %v723_v45  ;;  %v336_v4 = vpop.f32.mrb[5].mxu0  ;;  %v409_v5 = vpop.f32.mrb[5].mxu1 }
 0x126   :  { %v337_v6 = vadd.f32 %v336_v4, %v725_v46  ;;  %v410_v7 = vadd.f32 %v409_v5, %v727_v47  ;;  %v338_v8 = vpop.f32.mrb[6].mxu0  ;;  %v411_v9 = vpop.f32.mrb[6].mxu1 }
 0x127   :  { %444 = vst [vmem:[#allocation7 + $0x40] sm:$0xff] %v335_v2  ;;  %446 = vst [vmem:[#allocation7 + $0x50] sm:$0xff] %v408_v3  ;;  %v339_v10 = vadd.f32 %v338_v8, %v721_v44  ;;  %v412_v11 = vadd.f32 %v411_v9, %v723_v45  ;;  %v340_v12 = vpop.f32.mrb[7].mxu0  ;;  %v413_v13 = vpop.f32.mrb[7].mxu1 }
 0x128   :  { %445 = vst [vmem:[#allocation7 + $0x48] sm:$0xff] %v337_v6  ;;  %447 = vst [vmem:[#allocation7 + $0x58] sm:$0xff] %v410_v7  ;;  %v341_v14 = vadd.f32 %v340_v12, %v725_v46  ;;  %v414_v15 = vadd.f32 %v413_v13, %v727_v47 }
 0x129   :  { %448 = vst [vmem:[#allocation7 + $0x60] sm:$0xff] %v339_v10  ;;  %450 = vst [vmem:[#allocation7 + $0x70] sm:$0xff] %v412_v11 }
 0x12a   :  { %449 = vst [vmem:[#allocation7 + $0x68] sm:$0xff] %v341_v14  ;;  %451 = vst [vmem:[#allocation7 + $0x78] sm:$0xff] %v414_v15 }
 0x12c   :  { %v344_v16 = vpop.f32.mrb[8].mxu0  ;;  %v417_v17 = vpop.f32.mrb[8].mxu1 }
 0x12d   :  { %v345_v18 = vadd.f32 %v344_v16, %v721_v44  ;;  %v418_v19 = vadd.f32 %v417_v17, %v723_v45  ;;  %v346_v20 = vpop.f32.mrb[9].mxu0  ;;  %v419_v21 = vpop.f32.mrb[9].mxu1 }
 0x12e   :  { %v347_v22 = vadd.f32 %v346_v20, %v725_v46  ;;  %v420_v23 = vadd.f32 %v419_v21, %v727_v47  ;;  %v348_v24 = vpop.f32.mrb[10].mxu0  ;;  %v421_v25 = vpop.f32.mrb[10].mxu1 }
 0x12f   :  { %452 = vst [vmem:[#allocation7 + $0x80] sm:$0xff] %v345_v18  ;;  %454 = vst [vmem:[#allocation7 + $0x90] sm:$0xff] %v418_v19  ;;  %v349_v26 = vadd.f32 %v348_v24, %v721_v44  ;;  %v422_v27 = vadd.f32 %v421_v25, %v723_v45  ;;  %v350_v28 = vpop.f32.mrb[11].mxu0  ;;  %v423_v29 = vpop.f32.mrb[11].mxu1 }
 0x130   :  { %453 = vst [vmem:[#allocation7 + $0x88] sm:$0xff] %v347_v22  ;;  %455 = vst [vmem:[#allocation7 + $0x98] sm:$0xff] %v420_v23  ;;  %v351_v30 = vadd.f32 %v350_v28, %v725_v46  ;;  %v424_v31 = vadd.f32 %v423_v29, %v727_v47 }
 0x131   :  { %456 = vst [vmem:[#allocation7 + $0xa0] sm:$0xff] %v349_v26  ;;  %458 = vst [vmem:[#allocation7 + $0xb0] sm:$0xff] %v422_v27 }
 0x132   :  { %457 = vst [vmem:[#allocation7 + $0xa8] sm:$0xff] %v351_v30  ;;  %459 = vst [vmem:[#allocation7 + $0xb8] sm:$0xff] %v424_v31 }
 0x134   :  { %v354_v32 = vpop.f32.mrb[12].mxu0  ;;  %v427_v33 = vpop.f32.mrb[12].mxu1 }
 0x135   :  { %v355_v34 = vadd.f32 %v354_v32, %v721_v44  ;;  %v428_v35 = vadd.f32 %v427_v33, %v723_v45  ;;  %v356_v36 = vpop.f32.mrb[13].mxu0  ;;  %v429_v37 = vpop.f32.mrb[13].mxu1 }
 0x136   :  { %v357_v38 = vadd.f32 %v356_v36, %v725_v46  ;;  %v430_v39 = vadd.f32 %v429_v37, %v727_v47  ;;  %v358_v40 = vpop.f32.mrb[14].mxu0  ;;  %v431_v41 = vpop.f32.mrb[14].mxu1 }
 0x137   :  { %460 = vst [vmem:[#allocation7 + $0xc0] sm:$0xff] %v355_v34  ;;  %462 = vst [vmem:[#allocation7 + $0xd0] sm:$0xff] %v428_v35  ;;  %v359_v42 = vadd.f32 %v358_v40, %v721_v44  ;;  %v432_v43 = vadd.f32 %v431_v41, %v723_v45  ;;  %v360_v48 = vpop.f32.mrb[15].mxu0  ;;  %v433_v49 = vpop.f32.mrb[15].mxu1 }
 0x138   :  { %461 = vst [vmem:[#allocation7 + $0xc8] sm:$0xff] %v357_v38  ;;  %463 = vst [vmem:[#allocation7 + $0xd8] sm:$0xff] %v430_v39  ;;  %v361_v50 = vadd.f32 %v360_v48, %v725_v46  ;;  %v434_v51 = vadd.f32 %v433_v49, %v727_v47 }
 0x139   :  { %464 = vst [vmem:[#allocation7 + $0xe0] sm:$0xff] %v359_v42  ;;  %466 = vst [vmem:[#allocation7 + $0xf0] sm:$0xff] %v432_v43 }
 0x13a   :  { %465 = vst [vmem:[#allocation7 + $0xe8] sm:$0xff] %v361_v50  ;;  %467 = vst [vmem:[#allocation7 + $0xf8] sm:$0xff] %v434_v51 }
 0x13b   :  { %639 = shalt.err (!%p636_p6)
}
 0x13c   :  { %s640_s17 = scalar_lea.hbm %s776_s3, 4096 }
 0x13d   :  { %p641_p7 = scmp.ne.s32.totalorder %s776_s3, %s640_s17  ;;  %p644_p8 = scmp.lt.u32.totalorder %s640_s17, %s776_s3 }
 0x13f   :  { %p646_p9 = pnand %p644_p8, %p641_p7 }
 0x141   :  { %649 = shalt.err (!%p646_p9)
}
 0x142   :  { %s664_s22 = smov 512   ;;  %s665_s23 = smov 32  }
 0x143   :  { %479 = dma.vmem_to_hbm [thread:$0]  %s474_s13, 4096, %s776_s3, [#allocation4], %s664_s22, %s664_s22, %s665_s23  }
 0x144   :  { %654 = dma.done.wait [#allocation4], 4096  }
 0x145   :  { %655 = vsyncadd [#allocation4], 4294963200 }
 0x146   :  { %483 = vsyncpa [#allocation3], 1 }
 0x147   :  { %484 = vsyncpa [#allocation6], 1 }
 0x148   :  { %485 = vsyncpa [#allocation4], 1 }

</bundles_post_ra>
